<compile_context>
chip_gen: v6e
topology: v6e:2x2x1
jax: 0.10.0
libtpu: 0.0.40
codegen_flags: <defaults>
</compile_context>

<pallas_src>
import jax
import jax.numpy as jnp
from jax.experimental import pallas as pl
from jax.experimental.pallas import tpu as pltpu

HIDDEN_DIM = 20
A_PAD = 128  # lane-dense padded action dim used only inside the kernel


def actor_kernel(x_ref, w1_ref, b1_ref, w2_ref, b2_ref, out_ref):
    # fc1: (Bt, F) f32 @ (F, H) f32 -> f32 accumulate; bias add + relu on VPU.
    h = jnp.dot(x_ref[...], w1_ref[...], preferred_element_type=jnp.float32)
    h = jnp.maximum(h + b1_ref[...], 0.0)

    # out: (Bt, H) f32 @ (H, A_PAD) f32 -> f32 logits; padded lanes carry a
    # -1e30 bias so exp()==0 and they drop out of the softmax.
    logits = jnp.dot(h, w2_ref[...], preferred_element_type=jnp.float32) + b2_ref[...]

    # Numerically stable softmax over the lane-dense axis; exact divide so
    # each probability row sums to 1 within f32 rounding.
    m = jnp.max(logits, axis=-1, keepdims=True)
    e = jnp.exp(logits - m)
    denom = jnp.sum(e, axis=-1, keepdims=True)

    n_actions = out_ref.shape[-1]  # static
    out_ref[...] = (e[:, :n_actions] / denom).astype(out_ref.dtype)


def prepare_actor_params(w1, b1, w2, b2):
    """One-time parameter prep (call OUTSIDE the hot path).

    w1: (H, F), b1: (H,), w2: (A, H), b2: (A,)  -- nn.Linear conventions.
    Returns (w1_t, b1_r, w2_t, b2_r, n_actions): weights transposed to
    (in, out) f32, and the action dim padded to A_PAD lanes (zero weights,
    -1e30 bias) for the in-kernel matmul/softmax.
    """
    H, _F = w1.shape
    A = w2.shape[0]
    w1_t = jnp.asarray(w1, jnp.float32).T                                 # (F, H)
    b1_r = jnp.asarray(b1, jnp.float32).reshape(1, H)                     # (1, H)
    w2_t = (jnp.zeros((H, A_PAD), jnp.float32)
            .at[:, :A].set(jnp.asarray(w2, jnp.float32).T))               # (H, 128)
    b2_r = (jnp.full((1, A_PAD), -1e30, jnp.float32)
            .at[0, :A].set(jnp.asarray(b2, jnp.float32)))                 # (1, 128)
    return w1_t, b1_r, w2_t, b2_r, A


def _pick_batch_tile(B):
    # Largest multiple-of-8 tile that divides B while leaving >=2 grid blocks
    # (so both v7x TensorCores get work).  Small / odd batches: single block.
    if B < 16:
        return B
    for bt in (4096, 2048, 1024, 512, 256, 128, 64, 32, 16, 8):
        if B % bt == 0 and B // bt >= 2:
            return bt
    return B


def actor_net_forward(x, params):
    """x: (B, n_features) f32; params: output of prepare_actor_params."""
    w1_t, b1_r, w2_t, b2_r, n_actions = params
    B, F = x.shape
    H = w1_t.shape[1]

    x = jnp.asarray(x, jnp.float32)
    bt = _pick_batch_tile(B)
    grid = (B // bt,)

    cost = pl.CostEstimate(
        flops=2 * B * (F * H + H * A_PAD),
        transcendentals=B * A_PAD,
        bytes_accessed=(B * F * 4                     # x (f32)
                        + F * H * 4 + H * A_PAD * 4   # weights (f32)
                        + (H + A_PAD) * 4             # biases (f32)
                        + B * n_actions * 4),         # output (f32, un-padded)
    )

    out = pl.pallas_call(
        actor_kernel,
        out_shape=jax.ShapeDtypeStruct((B, n_actions), jnp.float32),
        grid_spec=pltpu.PrefetchScalarGridSpec(
            num_scalar_prefetch=0,
            grid=grid,
            in_specs=[
                pl.BlockSpec((bt, F), lambda i: (i, 0)),       # x: streamed per tile
                pl.BlockSpec((F, H), lambda i: (0, 0)),        # w1: VMEM-resident
                pl.BlockSpec((1, H), lambda i: (0, 0)),        # b1: VMEM-resident
                pl.BlockSpec((H, A_PAD), lambda i: (0, 0)),    # w2: VMEM-resident
                pl.BlockSpec((1, A_PAD), lambda i: (0, 0)),    # b2: VMEM-resident
            ],
            out_specs=pl.BlockSpec((bt, n_actions), lambda i: (i, 0)),
        ),
        compiler_params=pltpu.CompilerParams(
            dimension_semantics=("parallel",),   # shard batch across TCs (v7x)
            # Footprint even at bt=4096: 2x128 KiB x-bufs + 2x64 KiB out-bufs
            # + ~11 KiB weights << 32 MiB, safe on every generation.
            vmem_limit_bytes=32 * 1024 * 1024,
        ),
        cost_estimate=cost,
    )(x, w1_t, b1_r, w2_t, b2_r)

    return out


def init_actor_params(key, n_features, n_actions):
    """Deterministic init mirroring the PyTorch module:
    weights ~ Normal(0, 0.1); biases keep nn.Linear default U(-1/sqrt(fan_in), +)."""
    k1, k2, k3, k4 = jax.random.split(key, 4)
    w1 = 0.1 * jax.random.normal(k1, (HIDDEN_DIM, n_features), jnp.float32)
    b1_bound = 1.0 / jnp.sqrt(jnp.float32(n_features))
    b1 = jax.random.uniform(k2, (HIDDEN_DIM,), jnp.float32, -b1_bound, b1_bound)
    w2 = 0.1 * jax.random.normal(k3, (n_actions, HIDDEN_DIM), jnp.float32)
    b2_bound = 1.0 / jnp.sqrt(jnp.float32(HIDDEN_DIM))
    b2 = jax.random.uniform(k4, (n_actions,), jnp.float32, -b2_bound, b2_bound)
    return w1, b1, w2, b2


def _reference(x, w1, b1, w2, b2):
    h = jnp.maximum(x @ w1.T + b1, 0.0)
    return jax.nn.softmax(h @ w2.T + b2, axis=-1)


if __name__ == "__main__":
    key = jax.random.PRNGKey(0)
    n_features, n_actions, batch = 8, 4, 2

    kx, kp, kx2 = jax.random.split(key, 3)
    x = jax.random.normal(kx, (batch, n_features), jnp.float32)
    w1, b1, w2, b2 = init_actor_params(kp, n_features, n_actions)

    # One-time parameter preparation (outside the per-step hot path).
    params = prepare_actor_params(w1, b1, w2, b2)

    # Small-batch path (single block, grid=(1,)).
    out = jax.block_until_ready(actor_net_forward(x, params))
    ref = _reference(x, w1, b1, w2, b2)
    assert out.shape == (batch, n_actions)
    assert jnp.allclose(out, ref, atol=2e-2), "mismatch vs reference (small batch)"
    assert jnp.allclose(jnp.sum(out, axis=-1), 1.0, atol=1e-3)

    # Larger-batch path exercising the batch grid / VMEM-resident weights.
    B2 = 512
    x2 = jax.random.normal(kx2, (B2, n_features), jnp.float32)
    out2 = jax.block_until_ready(actor_net_forward(x2, params))
    ref2 = _reference(x2, w1, b1, w2, b2)
    assert out2.shape == (B2, n_actions)
    assert jnp.allclose(out2, ref2, atol=2e-2), "mismatch vs reference (tiled batch)"
    assert jnp.allclose(jnp.sum(out2, axis=-1), 1.0, atol=1e-3)

    print("KERNEL_OK")
</pallas_src>

<mosaic_0001>
module attributes {stable_mosaic.version = 11 : i64} {
  func.func @actor_kernel(%arg0: i32, %arg1: memref<2x8xf32, #tpu.memory_space<vmem>>, %arg2: memref<8x20xf32, #tpu.memory_space<vmem>>, %arg3: memref<1x20xf32, #tpu.memory_space<vmem>>, %arg4: memref<20x128xf32, #tpu.memory_space<vmem>>, %arg5: memref<1x128xf32, #tpu.memory_space<vmem>>, %arg6: memref<2x4xf32, #tpu.memory_space<vmem>>) attributes {dimension_semantics = [#tpu.dimension_semantics<parallel>], iteration_bounds = array<i64: 1>, scalar_prefetch = 0 : i64, scratch_operands = 0 : i64, tpu.core_type = #tpu.core_type<tc>, window_params = [{transform_indices = @transform_0, window_bounds = array<i64: 2, 8>}, {pipeline_mode = #tpu.pipeline_mode<synchronous>, transform_indices = @transform_1, window_bounds = array<i64: 8, 20>}, {pipeline_mode = #tpu.pipeline_mode<synchronous>, transform_indices = @transform_2, window_bounds = array<i64: 1, 20>}, {pipeline_mode = #tpu.pipeline_mode<synchronous>, transform_indices = @transform_3, window_bounds = array<i64: 20, 128>}, {pipeline_mode = #tpu.pipeline_mode<synchronous>, transform_indices = @transform_4, window_bounds = array<i64: 1, 128>}, {transform_indices = @transform_5, window_bounds = array<i64: 2, 4>}]} {
    %c0 = arith.constant 0 : index
    %c0_0 = arith.constant 0 : index
    %0 = vector.load %arg1[%c0, %c0_0] : memref<2x8xf32, #tpu.memory_space<vmem>>, vector<2x8xf32>
    %c0_1 = arith.constant 0 : index
    %c0_2 = arith.constant 0 : index
    %1 = vector.load %arg2[%c0_1, %c0_2] : memref<8x20xf32, #tpu.memory_space<vmem>>, vector<8x20xf32>
    %cst = arith.constant dense<0.000000e+00> : vector<2x20xf32>
    %2 = tpu.matmul %0, %1, %cst {dimension_numbers = #tpu.dot_dimension_numbers<[1], [0], [0], [1], [0, 0, 1, 1], [], []>} : vector<2x8xf32>, vector<8x20xf32>, vector<2x20xf32> -> vector<2x20xf32>
    %c0_3 = arith.constant 0 : index
    %c0_4 = arith.constant 0 : index
    %3 = vector.load %arg3[%c0_3, %c0_4] : memref<1x20xf32, #tpu.memory_space<vmem>>, vector<1x20xf32>
    %4 = vector.broadcast %3 : vector<1x20xf32> to vector<2x20xf32>
    %5 = arith.addf %2, %4 : vector<2x20xf32>
    %cst_5 = arith.constant 0.000000e+00 : f32
    %6 = vector.broadcast %cst_5 : f32 to vector<2x20xf32>
    %7 = arith.maximumf %5, %6 : vector<2x20xf32>
    %c0_6 = arith.constant 0 : index
    %c0_7 = arith.constant 0 : index
    %8 = vector.load %arg4[%c0_6, %c0_7] : memref<20x128xf32, #tpu.memory_space<vmem>>, vector<20x128xf32>
    %cst_8 = arith.constant dense<0.000000e+00> : vector<2x128xf32>
    %9 = tpu.matmul %7, %8, %cst_8 {dimension_numbers = #tpu.dot_dimension_numbers<[1], [0], [0], [1], [0, 0, 1, 1], [], []>} : vector<2x20xf32>, vector<20x128xf32>, vector<2x128xf32> -> vector<2x128xf32>
    %c0_9 = arith.constant 0 : index
    %c0_10 = arith.constant 0 : index
    %10 = vector.load %arg5[%c0_9, %c0_10] : memref<1x128xf32, #tpu.memory_space<vmem>>, vector<1x128xf32>
    %11 = vector.broadcast %10 : vector<1x128xf32> to vector<2x128xf32>
    %12 = arith.addf %9, %11 : vector<2x128xf32>
    %cst_11 = arith.constant dense<0xFF800000> : vector<2xf32>
    %13 = vector.multi_reduction <maximumf>, %12, %cst_11 [1] : vector<2x128xf32> to vector<2xf32>
    %14 = vector.shape_cast %13 : vector<2xf32> to vector<2x1xf32>
    %15 = vector.broadcast %14 : vector<2x1xf32> to vector<2x128xf32>
    %16 = arith.subf %12, %15 : vector<2x128xf32>
    %17 = math.exp %16 : vector<2x128xf32>
    %cst_12 = arith.constant dense<0.000000e+00> : vector<2xf32>
    %18 = vector.multi_reduction <add>, %17, %cst_12 [1] : vector<2x128xf32> to vector<2xf32>
    %19 = vector.shape_cast %18 : vector<2xf32> to vector<2x1xf32>
    %20 = vector.extract_strided_slice %17 {offsets = [0, 0], sizes = [2, 4], strides = [1, 1]} : vector<2x128xf32> to vector<2x4xf32>
    %21 = vector.broadcast %19 : vector<2x1xf32> to vector<2x4xf32>
    %22 = arith.divf %20, %21 : vector<2x4xf32>
    %c0_13 = arith.constant 0 : index
    %c0_14 = arith.constant 0 : index
    %23 = vector.load %arg6[%c0_13, %c0_14] : memref<2x4xf32, #tpu.memory_space<vmem>>, vector<2x4xf32>
    tpu.vector_store %arg6[%c0_13, %c0_14], %22 {strides = array<i32>} : memref<2x4xf32, #tpu.memory_space<vmem>>, vector<2x4xf32>,
    return
  }
  func.func @transform_0(%arg0: i32) -> (i32, i32) {
    %c0_i32 = arith.constant 0 : i32
    %c0_i32_0 = arith.constant 0 : i32
    return %arg0, %c0_i32 : i32, i32
  }
  func.func @transform_1(%arg0: i32) -> (i32, i32) {
    %c0_i32 = arith.constant 0 : i32
    %c0_i32_0 = arith.constant 0 : i32
    %c0_i32_1 = arith.constant 0 : i32
    return %c0_i32, %c0_i32_0 : i32, i32
  }
  func.func @transform_2(%arg0: i32) -> (i32, i32) {
    %c0_i32 = arith.constant 0 : i32
    %c0_i32_0 = arith.constant 0 : i32
    %c0_i32_1 = arith.constant 0 : i32
    return %c0_i32, %c0_i32_0 : i32, i32
  }
  func.func @transform_3(%arg0: i32) -> (i32, i32) {
    %c0_i32 = arith.constant 0 : i32
    %c0_i32_0 = arith.constant 0 : i32
    %c0_i32_1 = arith.constant 0 : i32
    return %c0_i32, %c0_i32_0 : i32, i32
  }
  func.func @transform_4(%arg0: i32) -> (i32, i32) {
    %c0_i32 = arith.constant 0 : i32
    %c0_i32_0 = arith.constant 0 : i32
    %c0_i32_1 = arith.constant 0 : i32
    return %c0_i32, %c0_i32_0 : i32, i32
  }
  func.func @transform_5(%arg0: i32) -> (i32, i32) {
    %c0_i32 = arith.constant 0 : i32
    %c0_i32_0 = arith.constant 0 : i32
    return %arg0, %c0_i32 : i32, i32
  }
}

</mosaic_0001>

<bundles_post_ra>
// kernel: tpu_custom_call.1
= control target key start
LH: loop header
LB: loop body
LE: loop exit
PB: predicated region body
PF: predicated region fallthrough
CT: control target
= control target key end

     0   :  { %10 = vsyncpa [#allocation3], 0  ;;  %s439_s0 = inlined_call_operand.hbm [shape: f32[2,8], index: 0, kind: input, shape index: {}]   ;;  %s440_s1 = inlined_call_operand.hbm [shape: f32[8,20], index: 1, kind: input, shape index: {}]   ;;  %s441_s2 = inlined_call_operand.vmem [shape: f32[1,20], index: 2, kind: input, shape index: {}]   ;;  %s442_s3 = inlined_call_operand.hbm [shape: f32[20,128], index: 3, kind: input, shape index: {}]   ;;  %s443_s4 = inlined_call_operand.vmem [shape: f32[1,128], index: 4, kind: input, shape index: {}]   ;;  %s444_s5 = inlined_call_operand.hbm [shape: f32[2,4], index: 5, kind: output, shape index: {}]  }
   0x1   :  { %11 = vsyncpa [#allocation6], 0 }
   0x2   :  { %12 = vsyncpa [#allocation4], 0  ;;  %s383_s18 = smov [#allocation5]   ;;  %s384_s20 = smov [#allocation2]  }
   0x3   :  { %s29_s19 = sshll.u32 %s383_s18, 4  ;;  %s19_s21 = sshll.u32 %s384_s20, 4  ;;  %s30_s19 = int_to_ptr.vmem [resolvable:$true] %s29_s19  ;;  %s20_s21 = int_to_ptr.vmem [resolvable:$true] %s19_s21 }
   0x4   :  { %s305_s22 = scalar_lea.vmem %s30_s19, 128  ;;  %p310_p1 = scmp.lt.s32.totalorder %s30_s19, %s30_s19 }
   0x5   :  { %p306_p0 = scmp.ne.s32.totalorder %s30_s19, %s305_s22  ;;  %p311_p2 = scmp.lt.s32.totalorder %s305_s22, %s305_s22 }
   0x7   :  { %p312_p3 = por %p311_p2, %p310_p1 }
   0x9   :  { %p313_p4 = pnand %p312_p3, %p306_p0 }
   0xb   :  { %316 = shalt.err (!%p313_p4)
}
   0xc   :  { %32 = dma.hbm_to_vmem [thread:$0]  %s440_s1, 128, %s30_s19, [#allocation6]  }
   0xd   :  { %s325_s25 = scalar_lea.vmem %s20_s21, 32  ;;  %p330_p6 = scmp.lt.s32.totalorder %s20_s21, %s20_s21 }
   0xe   :  { %p326_p5 = scmp.ne.s32.totalorder %s20_s21, %s325_s25  ;;  %p331_p7 = scmp.lt.s32.totalorder %s325_s25, %s325_s25 }
  0x10   :  { %p332_p8 = por %p331_p7, %p330_p6 }
  0x12   :  { %p333_p9 = pnand %p332_p8, %p326_p5 }
  0x14   :  { %336 = shalt.err (!%p333_p9)
}
  0x15   :  { %22 = dma.hbm_to_vmem [thread:$0]  %s439_s0, 32, %s20_s21, [#allocation3]  }
  0x16   :  { %s385_s28 = smov [#allocation7]  }
  0x17   :  { %s40_s29 = sshll.u32 %s385_s28, 4  ;;  %s41_s29 = int_to_ptr.vmem [resolvable:$true] %s40_s29 }
  0x18   :  { %s345_s30 = scalar_lea.vmem %s41_s29, 384  ;;  %p350_p11 = scmp.lt.s32.totalorder %s41_s29, %s41_s29 }
  0x19   :  { %p346_p10 = scmp.ne.s32.totalorder %s41_s29, %s345_s30  ;;  %p351_p12 = scmp.lt.s32.totalorder %s345_s30, %s345_s30 }
  0x1b   :  { %p352_p13 = por %p351_p12, %p350_p11 }
  0x1d   :  { %p353_p0 = pnand %p352_p13, %p346_p10 }
  0x1f   :  { %356 = shalt.err (!%p353_p0)
}
  0x20   :  { %s386_s1 = smov 128   ;;  %s387_s6 = smov 8  }
  0x21   :  { %46 = dma.hbm_to_vmem [thread:$0]  %s442_s3, 384, %s41_s29, [#allocation6], %s386_s1, %s386_s1, %s387_s6  }
  0x22   :  { %377 = dma.done.wait [#allocation3], 32  }
  0x23   :  { %378 = vsyncadd [#allocation3], 4294967264 }
  0x24   :  { %379 = dma.done.wait [#allocation6], 512  }
  0x25   :  { %380 = vsyncadd [#allocation6], 4294966784  ;;  %v388_v0 = vmov 0.0   ;;  %vm389_vm0 = vmmov 0   ;;  %vm67_vm1 = vcmask 64512   ;;  %v59_v1 = vld [vmem:[#allocation5] sm:$0xff] }
  0x26   :  { %271 = vmatprep.subr.mxu0 %v388_v0  ;;  %273 = vmatprep.mubr.msk.f32.mxu0 %vm389_vm0, %v388_v0  ;;  %v58_v2 = vld [vmem:[#allocation2] sm:$0x3]  ;;  %v144_v3 = vld [vmem:[#allocation7 + $0x10] sm:$0xf]  ;;  %vm156_vm2 = vcmask 1043456   ;;  %v143_v4 = vld [vmem:[#allocation7 + $0x8] sm:$0xff] }
  0x27   :  { %276 = vmatprep.subr.mxu1 %v388_v0  ;;  %282 = vmatprep.mubr.msk.f32.mxu1 %vm389_vm0, %v388_v0  ;;  %v142_v5 = vld [vmem:[#allocation7] sm:$0xff]  ;;  %v260_v6 = vld [vmem:[%s441_s2] ss:$0 sm:$0xff]  ;;  %vm152_vm3 = vcmask 162816   ;;  %vm230_vm4 = vcmask 1041408   ;;  %s390_s2 = smov [#allocation8]  }
  0x28   :  { %272 = vmatpush3.msra.mxu0 %v59_v1  ;;  %277 = vmatpush3.msk.msra.mxu1 %vm156_vm2, %v144_v3  ;;  %v262_v11 = vld [vmem:[%s443_s4] ss:$0 sm:$0xff]  ;;  %s250_s11 = sshll.u32 %s390_s2, 4  ;;  %vm242_vm5 = vcmask 25600   ;;  %s251_s11 = int_to_ptr.vmem [resolvable:$true] %s250_s11 }
  0x29   :  { %274 = vmatmul.mubr.msk.f32.vlgmr.msra.gmra.mxu0 %vm67_vm1, %v58_v2  ;;  %278 = vmatprep.subr.mxu1 %v388_v0  ;;  %s357_s4 = scalar_lea.vmem %s251_s11, 32  ;;  %p362_p2 = scmp.lt.s32.totalorder %s251_s11, %s251_s11 }
  0x2a   :  { %279 = vmatpush3.msra.mxu1 %v143_v4  ;;  %p358_p1 = scmp.ne.s32.totalorder %s251_s11, %s357_s4  ;;  %p363_p3 = scmp.lt.s32.totalorder %s357_s4, %s357_s4 }
  0x2b   :  { %280 = vmatprep.subr.mxu1 %v388_v0 }
  0x2c   :  { %281 = vmatpush3.msra.mxu1 %v142_v5  ;;  %p364_p4 = por %p363_p3, %p362_p2 }
  0x2e   :  { %p365_p5 = pnand %p364_p4, %p358_p1 }
  0xe9   :  { %v137_v7 = vpop.f32.mrf.mxu0 }
  0xea   :  { %v138_v8 = vadd.f32 %v260_v6, %v137_v7 }
  0xeb   :  { %v275_v9 = vpop.f32.mrf.mxu0 }
  0xec   :  { %v141_v10 = vmax.f32 %v138_v8, 0.0 }
  0xee   :  { %283 = vmatmul.mubr.msk.f32.vlgmr.msra.gmra.mxu1 %vm152_vm3, %v141_v10 }
 0x1ae   :  { %v226_v12 = vpop.f32.mrf.mxu1 }
 0x1af   :  { %v227_v13 = vadd.f32 %v262_v11, %v226_v12 }
 0x1b0   :  { %v284_v14 = vpop.f32.mrf.mxu1 }
 0x1b1   :  { %v231_v15 = vsel %vm230_vm4, %v227_v13, -inf }
 0x1b2   :  { %232 = vmax.xlane.f32.xlu0 %v231_v15 }
 0x23b   :  { %v233_v16 = vpop.xlane.xlu0 %232 }
 0x23c   :  { %v234_v17 = vsub.f32 %v227_v13, %v233_v16 }
 0x23e   :  { %v235_v18 = vmul.f32 1.442695, %v234_v17 }
 0x240   :  { %293 = vpow2.f32 %v235_v18 }
 0x24d   :  { %v294_v19 = vpop.eup %293 }
 0x24e   :  { %v237_v20 = vsel %vm230_vm4, %v294_v19, 0.0 }
 0x24f   :  { %238 = vadd.xlane.f32.xlu0 %v237_v20 }
 0x2d8   :  { %v239_v21 = vpop.xlane.xlu0 %238 }
 0x2d9   :  { %295 = vrcp.f32 %v239_v21 }
 0x2e6   :  { %v296_v22 = vpop.eup %295 }
 0x2e7   :  { %v241_v23 = vmul.f32 %v296_v22, %v294_v19 }
 0x2e9   :  { %243 = vst.msk [vmem:[#allocation8] sm:$0x3] %vm242_vm5, %v241_v23 }
 0x2ea   :  { %368 = shalt.err (!%p365_p5)
}
 0x2eb   :  { %253 = dma.vmem_to_hbm [thread:$0]  %s251_s11, 32, %s444_s5, [#allocation4]  }
 0x2ec   :  { %381 = dma.done.wait [#allocation4], 32  }
 0x2ed   :  { %382 = vsyncadd [#allocation4], 4294967264 }
 0x2ee   :  { %257 = vsyncpa [#allocation3], 1 }
 0x2ef   :  { %258 = vsyncpa [#allocation6], 1 }
 0x2f0   :  { %259 = vsyncpa [#allocation4], 1 }

</bundles_post_ra>
